<compile_context>
chip_gen: v7x
topology: tpu7x:2x2x1
jax: 0.10.0
libtpu: 0.0.40
codegen_flags: <defaults>
</compile_context>

<pallas_src>
import functools

import numpy as np
import jax
import jax.numpy as jnp
from jax.experimental import pallas as pl
from jax.experimental.pallas import tpu as pltpu


def _round_up(v, m):
    return ((v + m - 1) // m) * m


@functools.lru_cache(maxsize=1)
def _vmem_capacity_bytes():
    try:
        return int(getattr(pltpu.get_tpu_info(), "vmem_capacity_bytes",
                           64 * 1024 * 1024))
    except Exception:
        return 64 * 1024 * 1024  # conservative default (v7x per-core VMEM)


def make_cgc_kernel(n_task, eh_pad, gpad, hpad):
    def kernel(x_ref, w_ref, b_ref, sel_ref, red_ref, out_ref):
        # x_ref:   [Bt, D]                  f32 (cast to bf16 for the MXU here)
        # w_ref:   [D, EH_pad + T*G_pad]    bf16 fused expert + gate weights
        # b_ref:   [1, EH_pad + T*G_pad]    f32 fused biases (-1e30 in gate padding)
        # sel_ref: [T, G_pad, EH_pad]       bf16 0/1 gate -> expert-slab expansion
        # red_ref: [EH_pad, H_pad]          bf16 0/1 expert-block -> task-output reduce
        # out_ref: [Bt, T*H_pad]            f32, lane-dense (128-multiple) per task
        xb = x_ref[...].astype(jnp.bfloat16)
        z = jnp.dot(xb, w_ref[...], preferred_element_type=jnp.float32) + b_ref[...]
        h = z[:, :eh_pad]
        h = jnp.where(h > 0.0, h, 0.01 * h)          # LeakyReLU(0.01), all experts, f32 VPU
        for t in range(n_task):
            lg = z[:, eh_pad + t * gpad:eh_pad + (t + 1) * gpad]   # lane-aligned group
            m = jnp.max(lg, axis=1, keepdims=True)
            p = jnp.exp(lg - m)                                    # padded cols: exp(-1e30)=0
            g = p * pl.reciprocal(jnp.sum(p, axis=1, keepdims=True), approx=True)
            gw = jnp.dot(g.astype(jnp.bfloat16), sel_ref[t],
                         preferred_element_type=jnp.float32)        # [Bt, EH_pad]
            res = jnp.dot((h * gw).astype(jnp.bfloat16), red_ref[...],
                          preferred_element_type=jnp.float32)       # [Bt, H_pad]
            out_ref[:, t * hpad:(t + 1) * hpad] = res.astype(out_ref.dtype)
    return kernel


def cgc_prepare_params(we, be, wg, bg, *, n_task, n_experts, n_experts_share):
    """One-time (module-init) relayout into the fused, lane-padded bf16 layout.

    we: [E_total, D, H] expert weights, SHARED experts FIRST, pre-transposed so
        expert e computes x @ we[e] + be[e];  be: [E_total, H];
    wg: [n_task, D, NE];  bg: [n_task, NE]  with NE = n_experts + n_experts_share.
    """
    e_total, d, h = we.shape
    ne = n_experts + n_experts_share
    eh = e_total * h
    eh_pad = _round_up(eh, 128)
    gpad = _round_up(ne, 128)
    hpad = _round_up(h, 128)
    n_fused = eh_pad + n_task * gpad

    we_all = jnp.transpose(we, (1, 0, 2)).reshape(d, eh)
    w_fused = jnp.zeros((d, n_fused), jnp.float32).at[:, :eh].set(we_all)
    b_fused = jnp.zeros((1, n_fused), jnp.float32).at[0, :eh].set(be.reshape(eh))
    for t in range(n_task):
        c0 = eh_pad + t * gpad
        w_fused = w_fused.at[:, c0:c0 + ne].set(wg[t])
        b_fused = b_fused.at[0, c0:c0 + ne].set(bg[t])
        # padded gate columns: zero weight, -1e30 bias  ->  softmax weight exactly 0
        b_fused = b_fused.at[0, c0 + ne:c0 + gpad].set(-1e30)

    sel = np.zeros((n_task, gpad, eh_pad), np.float32)
    red = np.zeros((eh_pad, hpad), np.float32)
    eye_h = np.eye(h, dtype=np.float32)
    for e in range(e_total):
        red[e * h:(e + 1) * h, :h] = eye_h
    for t in range(n_task):
        # expert ordering per task: shared experts first, then the task's own experts
        idxs = list(range(n_experts_share)) + [
            n_experts_share + t * n_experts + j for j in range(n_experts)]
        for k, e in enumerate(idxs):
            sel[t, k, e * h:(e + 1) * h] = 1.0

    return (w_fused.astype(jnp.bfloat16), b_fused,
            jnp.asarray(sel, dtype=jnp.bfloat16),
            jnp.asarray(red, dtype=jnp.bfloat16))


def _vmem_bytes(bt, d, n_fused, n_task, gpad, eh_pad, hpad, single_buffer_weights):
    def t32(r, c):  # f32 VMEM footprint of an [r, c] tile, (8,128)-padded
        return 4 * _round_up(max(r, 1), 8) * _round_up(max(c, 1), 128)

    def t16(r, c):  # bf16 tile, (16,128)-padded
        return 2 * _round_up(max(r, 1), 16) * _round_up(max(c, 1), 128)

    wbuf = 1 if single_buffer_weights else 2
    resident = wbuf * (t16(d, n_fused) + t32(1, n_fused)
                       + n_task * t16(gpad, eh_pad) + t16(eh_pad, hpad))
    streamed = 2 * (t32(bt, d) + t32(bt, n_task * hpad))      # double-buffered x / out
    # kernel-materialized intermediates: z, h, gw, h*gw, per-task softmax temps, result
    intermediates = (t32(bt, n_fused) + 3 * t32(bt, eh_pad)
                     + 2 * t32(bt, gpad) + t32(bt, hpad))
    return resident + streamed + intermediates


@functools.partial(jax.jit, static_argnames=("expert_dim", "single_buffer_weights"))
def cgc_forward(x, w_fused, b_fused, sel, red, *, expert_dim,
                single_buffer_weights=True):
    """x: [B, D] f32; remaining args from cgc_prepare_params.
    Returns [n_task, B, expert_dim] (stack of per-task outputs)."""
    B, d = x.shape
    n_fused = w_fused.shape[1]
    n_task, gpad, eh_pad = sel.shape
    hpad = red.shape[1]
    out_w = n_task * hpad

    # ---- generation-aware VMEM budgeting ----
    cap = _vmem_capacity_bytes()
    budget = int(cap * 0.72)          # ~92 MiB on v5e/v6e (128 MiB), ~46 MiB on v7x (64 MiB)

    # ---- batch tiling ----
    bt = min(512, _round_up(B, 8))
    if B >= 256:
        # prefer >= 2 tiles so v7x's second TensorCore gets a share of the batch
        bt = min(bt, _round_up(-(-B // 2), 8))
    while bt > 8 and _vmem_bytes(bt, d, n_fused, n_task, gpad, eh_pad, hpad,
                                 single_buffer_weights) > budget:
        bt = _round_up(bt // 2, 8)
    n_tiles = -(-B // bt)
    pB = n_tiles * bt
    xp = x if pB == B else jnp.pad(x, ((0, pB - B), (0, 0)))

    need = _vmem_bytes(bt, d, n_fused, n_task, gpad, eh_pad, hpad, single_buffer_weights)
    vmem_limit = int(min(cap * 0.80, max(32 * 1024 * 1024, 1.3 * need)))

    resident_kw = dict(pipeline_mode=pl.Buffered(1)) if single_buffer_weights else {}

    kernel = make_cgc_kernel(n_task, eh_pad, gpad, hpad)
    out = pl.pallas_call(
        kernel,
        out_shape=jax.ShapeDtypeStruct((pB, out_w), jnp.float32),
        grid_spec=pltpu.PrefetchScalarGridSpec(
            num_scalar_prefetch=0,
            grid=(n_tiles,),
            in_specs=[
                pl.BlockSpec((bt, d), lambda i: (i, 0)),                        # x (pipelined)
                pl.BlockSpec((d, n_fused), lambda i: (0, 0), **resident_kw),    # fused W
                pl.BlockSpec((1, n_fused), lambda i: (0, 0), **resident_kw),    # fused b
                pl.BlockSpec((n_task, gpad, eh_pad), lambda i: (0, 0, 0), **resident_kw),
                pl.BlockSpec((eh_pad, hpad), lambda i: (0, 0), **resident_kw),  # shared red
            ],
            out_specs=pl.BlockSpec((bt, out_w), lambda i: (i, 0)),
        ),
        compiler_params=pltpu.CompilerParams(
            dimension_semantics=("parallel",),
            vmem_limit_bytes=vmem_limit,
        ),
    )(xp, w_fused, b_fused, sel, red)

    out = out[:B].reshape(B, n_task, hpad)[:, :, :expert_dim]
    return jnp.transpose(out, (1, 0, 2))       # [n_task, B, H]


def cgc_reference(x, we, be, wg, bg, n_task, n_experts, n_experts_share):
    """Pure-JAX reference mirroring the PyTorch forward."""
    e_total = we.shape[0]
    eouts = [jax.nn.leaky_relu(x @ we[e] + be[e], negative_slope=0.01)
             for e in range(e_total)]
    outs = []
    for t in range(n_task):
        g = jax.nn.softmax(x @ wg[t] + bg[t], axis=1)          # [B, NE]
        idxs = list(range(n_experts_share)) + [
            n_experts_share + t * n_experts + j for j in range(n_experts)]
        e_stack = jnp.stack([eouts[i] for i in idxs], axis=1)   # [B, NE, H]
        outs.append(jnp.einsum("bn,bnh->bh", g, e_stack))
    return jnp.stack(outs, axis=0)


if __name__ == "__main__":
    # Small shapes consistent with the module's forward (x: [B, input_dim]).
    B = 8
    input_dim = 32
    expert_dim = 16
    n_task = 2
    n_experts = 3
    n_experts_share = 2

    e_total = n_experts_share + n_task * n_experts
    ne = n_experts + n_experts_share

    key = jax.random.PRNGKey(0)
    kx, kwe, kbe, kwg, kbg = jax.random.split(key, 5)

    x = jax.random.normal(kx, (B, input_dim), dtype=jnp.float32)
    # Parameters stored pre-transposed as [D_in, out]; shared experts first.
    we = jax.random.normal(kwe, (e_total, input_dim, expert_dim), dtype=jnp.float32) * 0.1
    be = jax.random.normal(kbe, (e_total, expert_dim), dtype=jnp.float32) * 0.1
    wg = jax.random.normal(kwg, (n_task, input_dim, ne), dtype=jnp.float32) * 0.1
    bg = jax.random.normal(kbg, (n_task, ne), dtype=jnp.float32) * 0.1

    # One-time weight relayout (module init), hoisted out of the jitted forward.
    params = cgc_prepare_params(
        we, be, wg, bg,
        n_task=n_task, n_experts=n_experts, n_experts_share=n_experts_share)

    try:
        out = jax.block_until_ready(cgc_forward(x, *params, expert_dim=expert_dim))
    except Exception:
        # Fallback if this Pallas build rejects single-buffered (pl.Buffered(1)) weights.
        out = jax.block_until_ready(
            cgc_forward(x, *params, expert_dim=expert_dim, single_buffer_weights=False))

    ref = cgc_reference(x, we, be, wg, bg, n_task, n_experts, n_experts_share)
    assert out.shape == (n_task, B, expert_dim)
    # bf16 MXU operands + approximate softmax reciprocal -> looser tolerance vs f32 ref
    assert jnp.allclose(out, ref, atol=2e-2, rtol=2e-2), "mismatch vs JAX reference"

    print("KERNEL_OK")
</pallas_src>

<mosaic_0001>
module attributes {stable_mosaic.version = 11 : i64} {
  func.func @kernel(%arg0: i32, %arg1: memref<8x32xf32, #tpu.memory_space<vmem>>, %arg2: memref<32x384xbf16, #tpu.memory_space<vmem>>, %arg3: memref<1x384xf32, #tpu.memory_space<vmem>>, %arg4: memref<2x128x128xbf16, #tpu.memory_space<vmem>>, %arg5: memref<128x128xbf16, #tpu.memory_space<vmem>>, %arg6: memref<8x256xf32, #tpu.memory_space<vmem>>) attributes {dimension_semantics = [#tpu.dimension_semantics<parallel>], iteration_bounds = array<i64: 1>, scalar_prefetch = 0 : i64, scratch_operands = 0 : i64, tpu.core_type = #tpu.core_type<tc>, window_params = [{transform_indices = @transform_0, window_bounds = array<i64: 8, 32>}, {pipeline_mode = #tpu.pipeline_mode<synchronous>, transform_indices = @transform_1, window_bounds = array<i64: 32, 384>}, {pipeline_mode = #tpu.pipeline_mode<synchronous>, transform_indices = @transform_2, window_bounds = array<i64: 1, 384>}, {pipeline_mode = #tpu.pipeline_mode<synchronous>, transform_indices = @transform_3, window_bounds = array<i64: 2, 128, 128>}, {pipeline_mode = #tpu.pipeline_mode<synchronous>, transform_indices = @transform_4, window_bounds = array<i64: 128, 128>}, {transform_indices = @transform_5, window_bounds = array<i64: 8, 256>}]} {
    %c0 = arith.constant 0 : index
    %c0_0 = arith.constant 0 : index
    %0 = vector.load %arg1[%c0, %c0_0] : memref<8x32xf32, #tpu.memory_space<vmem>>, vector<8x32xf32>
    %1 = arith.truncf %0 : vector<8x32xf32> to vector<8x32xbf16>
    %c0_1 = arith.constant 0 : index
    %c0_2 = arith.constant 0 : index
    %2 = vector.load %arg2[%c0_1, %c0_2] : memref<32x384xbf16, #tpu.memory_space<vmem>>, vector<32x384xbf16>
    %cst = arith.constant dense<0.000000e+00> : vector<8x384xf32>
    %3 = tpu.matmul %1, %2, %cst {dimension_numbers = #tpu.dot_dimension_numbers<[1], [0], [0], [1], [0, 0, 1, 1], [], []>} : vector<8x32xbf16>, vector<32x384xbf16>, vector<8x384xf32> -> vector<8x384xf32>
    %c0_3 = arith.constant 0 : index
    %c0_4 = arith.constant 0 : index
    %4 = vector.load %arg3[%c0_3, %c0_4] : memref<1x384xf32, #tpu.memory_space<vmem>>, vector<1x384xf32>
    %5 = vector.broadcast %4 : vector<1x384xf32> to vector<8x384xf32>
    %6 = arith.addf %3, %5 : vector<8x384xf32>
    %7 = vector.extract_strided_slice %6 {offsets = [0, 0], sizes = [8, 128], strides = [1, 1]} : vector<8x384xf32> to vector<8x128xf32>
    %cst_5 = arith.constant 0.000000e+00 : f32
    %8 = vector.broadcast %cst_5 : f32 to vector<8x128xf32>
    %9 = arith.cmpf ogt, %7, %8 : vector<8x128xf32>
    %cst_6 = arith.constant 0.00999999977 : f32
    %10 = vector.broadcast %cst_6 : f32 to vector<8x128xf32>
    %11 = arith.mulf %10, %7 : vector<8x128xf32>
    %12 = arith.select %9, %7, %11 : vector<8x128xi1>, vector<8x128xf32>
    %13 = vector.extract_strided_slice %6 {offsets = [0, 128], sizes = [8, 128], strides = [1, 1]} : vector<8x384xf32> to vector<8x128xf32>
    %cst_7 = arith.constant dense<0xFF800000> : vector<8xf32>
    %14 = vector.multi_reduction <maximumf>, %13, %cst_7 [1] : vector<8x128xf32> to vector<8xf32>
    %15 = vector.shape_cast %14 : vector<8xf32> to vector<8x1xf32>
    %16 = vector.broadcast %15 : vector<8x1xf32> to vector<8x128xf32>
    %17 = arith.subf %13, %16 : vector<8x128xf32>
    %18 = math.exp %17 : vector<8x128xf32>
    %cst_8 = arith.constant dense<0.000000e+00> : vector<8xf32>
    %19 = vector.multi_reduction <add>, %18, %cst_8 [1] : vector<8x128xf32> to vector<8xf32>
    %20 = vector.shape_cast %19 : vector<8xf32> to vector<8x1xf32>
    %21 = tpu.reciprocal %20 {approx = true} : vector<8x1xf32> -> vector<8x1xf32>
    %22 = vector.broadcast %21 : vector<8x1xf32> to vector<8x128xf32>
    %23 = arith.mulf %18, %22 : vector<8x128xf32>
    %24 = arith.truncf %23 : vector<8x128xf32> to vector<8x128xbf16>
    %c0_9 = arith.constant 0 : index
    %c0_10 = arith.constant 0 : index
    %c0_11 = arith.constant 0 : index
    %25 = vector.load %arg4[%c0_9, %c0_10, %c0_11] : memref<2x128x128xbf16, #tpu.memory_space<vmem>>, vector<1x128x128xbf16>
    %26 = vector.shape_cast %25 : vector<1x128x128xbf16> to vector<128x128xbf16>
    %cst_12 = arith.constant dense<0.000000e+00> : vector<8x128xf32>
    %27 = tpu.matmul %24, %26, %cst_12 {dimension_numbers = #tpu.dot_dimension_numbers<[1], [0], [0], [1], [0, 0, 1, 1], [], []>} : vector<8x128xbf16>, vector<128x128xbf16>, vector<8x128xf32> -> vector<8x128xf32>
    %28 = arith.mulf %12, %27 : vector<8x128xf32>
    %29 = arith.truncf %28 : vector<8x128xf32> to vector<8x128xbf16>
    %c0_13 = arith.constant 0 : index
    %c0_14 = arith.constant 0 : index
    %30 = vector.load %arg5[%c0_13, %c0_14] : memref<128x128xbf16, #tpu.memory_space<vmem>>, vector<128x128xbf16>
    %cst_15 = arith.constant dense<0.000000e+00> : vector<8x128xf32>
    %31 = tpu.matmul %29, %30, %cst_15 {dimension_numbers = #tpu.dot_dimension_numbers<[1], [0], [0], [1], [0, 0, 1, 1], [], []>} : vector<8x128xbf16>, vector<128x128xbf16>, vector<8x128xf32> -> vector<8x128xf32>
    %c0_16 = arith.constant 0 : index
    %c0_17 = arith.constant 0 : index
    %32 = vector.load %arg6[%c0_16, %c0_17] : memref<8x256xf32, #tpu.memory_space<vmem>>, vector<8x128xf32>
    tpu.vector_store %arg6[%c0_16, %c0_17], %31 {strides = array<i32>} : memref<8x256xf32, #tpu.memory_space<vmem>>, vector<8x128xf32>,
    %33 = vector.extract_strided_slice %6 {offsets = [0, 256], sizes = [8, 128], strides = [1, 1]} : vector<8x384xf32> to vector<8x128xf32>
    %cst_18 = arith.constant dense<0xFF800000> : vector<8xf32>
    %34 = vector.multi_reduction <maximumf>, %33, %cst_18 [1] : vector<8x128xf32> to vector<8xf32>
    %35 = vector.shape_cast %34 : vector<8xf32> to vector<8x1xf32>
    %36 = vector.broadcast %35 : vector<8x1xf32> to vector<8x128xf32>
    %37 = arith.subf %33, %36 : vector<8x128xf32>
    %38 = math.exp %37 : vector<8x128xf32>
    %cst_19 = arith.constant dense<0.000000e+00> : vector<8xf32>
    %39 = vector.multi_reduction <add>, %38, %cst_19 [1] : vector<8x128xf32> to vector<8xf32>
    %40 = vector.shape_cast %39 : vector<8xf32> to vector<8x1xf32>
    %41 = tpu.reciprocal %40 {approx = true} : vector<8x1xf32> -> vector<8x1xf32>
    %42 = vector.broadcast %41 : vector<8x1xf32> to vector<8x128xf32>
    %43 = arith.mulf %38, %42 : vector<8x128xf32>
    %44 = arith.truncf %43 : vector<8x128xf32> to vector<8x128xbf16>
    %c1 = arith.constant 1 : index
    %c0_20 = arith.constant 0 : index
    %c0_21 = arith.constant 0 : index
    %45 = vector.load %arg4[%c1, %c0_20, %c0_21] : memref<2x128x128xbf16, #tpu.memory_space<vmem>>, vector<1x128x128xbf16>
    %46 = vector.shape_cast %45 : vector<1x128x128xbf16> to vector<128x128xbf16>
    %cst_22 = arith.constant dense<0.000000e+00> : vector<8x128xf32>
    %47 = tpu.matmul %44, %46, %cst_22 {dimension_numbers = #tpu.dot_dimension_numbers<[1], [0], [0], [1], [0, 0, 1, 1], [], []>} : vector<8x128xbf16>, vector<128x128xbf16>, vector<8x128xf32> -> vector<8x128xf32>
    %48 = arith.mulf %12, %47 : vector<8x128xf32>
    %49 = arith.truncf %48 : vector<8x128xf32> to vector<8x128xbf16>
    %c0_23 = arith.constant 0 : index
    %c0_24 = arith.constant 0 : index
    %50 = vector.load %arg5[%c0_23, %c0_24] : memref<128x128xbf16, #tpu.memory_space<vmem>>, vector<128x128xbf16>
    %cst_25 = arith.constant dense<0.000000e+00> : vector<8x128xf32>
    %51 = tpu.matmul %49, %50, %cst_25 {dimension_numbers = #tpu.dot_dimension_numbers<[1], [0], [0], [1], [0, 0, 1, 1], [], []>} : vector<8x128xbf16>, vector<128x128xbf16>, vector<8x128xf32> -> vector<8x128xf32>
    %c0_26 = arith.constant 0 : index
    %c128 = arith.constant 128 : index
    %52 = vector.load %arg6[%c0_26, %c128] : memref<8x256xf32, #tpu.memory_space<vmem>>, vector<8x128xf32>
    tpu.vector_store %arg6[%c0_26, %c128], %51 {strides = array<i32>} : memref<8x256xf32, #tpu.memory_space<vmem>>, vector<8x128xf32>,
    return
  }
  func.func @transform_0(%arg0: i32) -> (i32, i32) {
    %c0_i32 = arith.constant 0 : i32
    %c0_i32_0 = arith.constant 0 : i32
    return %arg0, %c0_i32 : i32, i32
  }
  func.func @transform_1(%arg0: i32) -> (i32, i32) {
    %c0_i32 = arith.constant 0 : i32
    %c0_i32_0 = arith.constant 0 : i32
    %c0_i32_1 = arith.constant 0 : i32
    return %c0_i32, %c0_i32_0 : i32, i32
  }
  func.func @transform_2(%arg0: i32) -> (i32, i32) {
    %c0_i32 = arith.constant 0 : i32
    %c0_i32_0 = arith.constant 0 : i32
    %c0_i32_1 = arith.constant 0 : i32
    return %c0_i32, %c0_i32_0 : i32, i32
  }
  func.func @transform_3(%arg0: i32) -> (i32, i32, i32) {
    %c0_i32 = arith.constant 0 : i32
    %c0_i32_0 = arith.constant 0 : i32
    %c0_i32_1 = arith.constant 0 : i32
    %c0_i32_2 = arith.constant 0 : i32
    return %c0_i32, %c0_i32_0, %c0_i32_1 : i32, i32, i32
  }
  func.func @transform_4(%arg0: i32) -> (i32, i32) {
    %c0_i32 = arith.constant 0 : i32
    %c0_i32_0 = arith.constant 0 : i32
    %c0_i32_1 = arith.constant 0 : i32
    return %c0_i32, %c0_i32_0 : i32, i32
  }
  func.func @transform_5(%arg0: i32) -> (i32, i32) {
    %c0_i32 = arith.constant 0 : i32
    %c0_i32_0 = arith.constant 0 : i32
    return %arg0, %c0_i32 : i32, i32
  }
}

module attributes {stable_mosaic.version = 11 : i64} {
  func.func @kernel(%arg0: i32, %arg1: memref<8x32xf32, #tpu.memory_space<vmem>>, %arg2: memref<32x384xbf16, #tpu.memory_space<vmem>>, %arg3: memref<1x384xf32, #tpu.memory_space<vmem>>, %arg4: memref<2x128x128xbf16, #tpu.memory_space<vmem>>, %arg5: memref<128x128xbf16, #tpu.memory_space<vmem>>, %arg6: memref<8x256xf32, #tpu.memory_space<vmem>>) attributes {dimension_semantics = [#tpu.dimension_semantics<parallel>], iteration_bounds = array<i64: 1>, scalar_prefetch = 0 : i64, scratch_operands = 0 : i64, tpu.core_type = #tpu.core_type<tc>, window_params = [{transform_indices = @transform_0, window_bounds = array<i64: 8, 32>}, {pipeline_mode = #tpu.pipeline_mode<synchronous>, transform_indices = @transform_1, window_bounds = array<i64: 32, 384>}, {pipeline_mode = #tpu.pipeline_mode<synchronous>, transform_indices = @transform_2, window_bounds = array<i64: 1, 384>}, {pipeline_mode = #tpu.pipeline_mode<synchronous>, transform_indices = @transform_3, window_bounds = array<i64: 2, 128, 128>}, {pipeline_mode = #tpu.pipeline_mode<synchronous>, transform_indices = @transform_4, window_bounds = array<i64: 128, 128>}, {transform_indices = @transform_5, window_bounds = array<i64: 8, 256>}]} {
    %c0 = arith.constant 0 : index
    %c0_0 = arith.constant 0 : index
    %0 = vector.load %arg1[%c0, %c0_0] : memref<8x32xf32, #tpu.memory_space<vmem>>, vector<8x32xf32>
    %1 = arith.truncf %0 : vector<8x32xf32> to vector<8x32xbf16>
    %c0_1 = arith.constant 0 : index
    %c0_2 = arith.constant 0 : index
    %2 = vector.load %arg2[%c0_1, %c0_2] : memref<32x384xbf16, #tpu.memory_space<vmem>>, vector<32x384xbf16>
    %cst = arith.constant dense<0.000000e+00> : vector<8x384xf32>
    %3 = tpu.matmul %1, %2, %cst {dimension_numbers = #tpu.dot_dimension_numbers<[1], [0], [0], [1], [0, 0, 1, 1], [], []>} : vector<8x32xbf16>, vector<32x384xbf16>, vector<8x384xf32> -> vector<8x384xf32>
    %c0_3 = arith.constant 0 : index
    %c0_4 = arith.constant 0 : index
    %4 = vector.load %arg3[%c0_3, %c0_4] : memref<1x384xf32, #tpu.memory_space<vmem>>, vector<1x384xf32>
    %5 = vector.broadcast %4 : vector<1x384xf32> to vector<8x384xf32>
    %6 = arith.addf %3, %5 : vector<8x384xf32>
    %7 = vector.extract_strided_slice %6 {offsets = [0, 0], sizes = [8, 128], strides = [1, 1]} : vector<8x384xf32> to vector<8x128xf32>
    %cst_5 = arith.constant 0.000000e+00 : f32
    %8 = vector.broadcast %cst_5 : f32 to vector<8x128xf32>
    %9 = arith.cmpf ogt, %7, %8 : vector<8x128xf32>
    %cst_6 = arith.constant 0.00999999977 : f32
    %10 = vector.broadcast %cst_6 : f32 to vector<8x128xf32>
    %11 = arith.mulf %10, %7 : vector<8x128xf32>
    %12 = arith.select %9, %7, %11 : vector<8x128xi1>, vector<8x128xf32>
    %13 = vector.extract_strided_slice %6 {offsets = [0, 128], sizes = [8, 128], strides = [1, 1]} : vector<8x384xf32> to vector<8x128xf32>
    %cst_7 = arith.constant dense<0xFF800000> : vector<8xf32>
    %14 = vector.multi_reduction <maximumf>, %13, %cst_7 [1] : vector<8x128xf32> to vector<8xf32>
    %15 = vector.shape_cast %14 : vector<8xf32> to vector<8x1xf32>
    %16 = vector.broadcast %15 : vector<8x1xf32> to vector<8x128xf32>
    %17 = arith.subf %13, %16 : vector<8x128xf32>
    %18 = math.exp %17 : vector<8x128xf32>
    %cst_8 = arith.constant dense<0.000000e+00> : vector<8xf32>
    %19 = vector.multi_reduction <add>, %18, %cst_8 [1] : vector<8x128xf32> to vector<8xf32>
    %20 = vector.shape_cast %19 : vector<8xf32> to vector<8x1xf32>
    %21 = tpu.reciprocal %20 {approx = true} : vector<8x1xf32> -> vector<8x1xf32>
    %22 = vector.broadcast %21 : vector<8x1xf32> to vector<8x128xf32>
    %23 = arith.mulf %18, %22 : vector<8x128xf32>
    %24 = arith.truncf %23 : vector<8x128xf32> to vector<8x128xbf16>
    %c0_9 = arith.constant 0 : index
    %c0_10 = arith.constant 0 : index
    %c0_11 = arith.constant 0 : index
    %25 = vector.load %arg4[%c0_9, %c0_10, %c0_11] : memref<2x128x128xbf16, #tpu.memory_space<vmem>>, vector<1x128x128xbf16>
    %26 = vector.shape_cast %25 : vector<1x128x128xbf16> to vector<128x128xbf16>
    %cst_12 = arith.constant dense<0.000000e+00> : vector<8x128xf32>
    %27 = tpu.matmul %24, %26, %cst_12 {dimension_numbers = #tpu.dot_dimension_numbers<[1], [0], [0], [1], [0, 0, 1, 1], [], []>} : vector<8x128xbf16>, vector<128x128xbf16>, vector<8x128xf32> -> vector<8x128xf32>
    %28 = arith.mulf %12, %27 : vector<8x128xf32>
    %29 = arith.truncf %28 : vector<8x128xf32> to vector<8x128xbf16>
    %c0_13 = arith.constant 0 : index
    %c0_14 = arith.constant 0 : index
    %30 = vector.load %arg5[%c0_13, %c0_14] : memref<128x128xbf16, #tpu.memory_space<vmem>>, vector<128x128xbf16>
    %cst_15 = arith.constant dense<0.000000e+00> : vector<8x128xf32>
    %31 = tpu.matmul %29, %30, %cst_15 {dimension_numbers = #tpu.dot_dimension_numbers<[1], [0], [0], [1], [0, 0, 1, 1], [], []>} : vector<8x128xbf16>, vector<128x128xbf16>, vector<8x128xf32> -> vector<8x128xf32>
    %c0_16 = arith.constant 0 : index
    %c0_17 = arith.constant 0 : index
    %32 = vector.load %arg6[%c0_16, %c0_17] : memref<8x256xf32, #tpu.memory_space<vmem>>, vector<8x128xf32>
    tpu.vector_store %arg6[%c0_16, %c0_17], %31 {strides = array<i32>} : memref<8x256xf32, #tpu.memory_space<vmem>>, vector<8x128xf32>,
    %33 = vector.extract_strided_slice %6 {offsets = [0, 256], sizes = [8, 128], strides = [1, 1]} : vector<8x384xf32> to vector<8x128xf32>
    %cst_18 = arith.constant dense<0xFF800000> : vector<8xf32>
    %34 = vector.multi_reduction <maximumf>, %33, %cst_18 [1] : vector<8x128xf32> to vector<8xf32>
    %35 = vector.shape_cast %34 : vector<8xf32> to vector<8x1xf32>
    %36 = vector.broadcast %35 : vector<8x1xf32> to vector<8x128xf32>
    %37 = arith.subf %33, %36 : vector<8x128xf32>
    %38 = math.exp %37 : vector<8x128xf32>
    %cst_19 = arith.constant dense<0.000000e+00> : vector<8xf32>
    %39 = vector.multi_reduction <add>, %38, %cst_19 [1] : vector<8x128xf32> to vector<8xf32>
    %40 = vector.shape_cast %39 : vector<8xf32> to vector<8x1xf32>
    %41 = tpu.reciprocal %40 {approx = true} : vector<8x1xf32> -> vector<8x1xf32>
    %42 = vector.broadcast %41 : vector<8x1xf32> to vector<8x128xf32>
    %43 = arith.mulf %38, %42 : vector<8x128xf32>
    %44 = arith.truncf %43 : vector<8x128xf32> to vector<8x128xbf16>
    %c1 = arith.constant 1 : index
    %c0_20 = arith.constant 0 : index
    %c0_21 = arith.constant 0 : index
    %45 = vector.load %arg4[%c1, %c0_20, %c0_21] : memref<2x128x128xbf16, #tpu.memory_space<vmem>>, vector<1x128x128xbf16>
    %46 = vector.shape_cast %45 : vector<1x128x128xbf16> to vector<128x128xbf16>
    %cst_22 = arith.constant dense<0.000000e+00> : vector<8x128xf32>
    %47 = tpu.matmul %44, %46, %cst_22 {dimension_numbers = #tpu.dot_dimension_numbers<[1], [0], [0], [1], [0, 0, 1, 1], [], []>} : vector<8x128xbf16>, vector<128x128xbf16>, vector<8x128xf32> -> vector<8x128xf32>
    %48 = arith.mulf %12, %47 : vector<8x128xf32>
    %49 = arith.truncf %48 : vector<8x128xf32> to vector<8x128xbf16>
    %c0_23 = arith.constant 0 : index
    %c0_24 = arith.constant 0 : index
    %50 = vector.load %arg5[%c0_23, %c0_24] : memref<128x128xbf16, #tpu.memory_space<vmem>>, vector<128x128xbf16>
    %cst_25 = arith.constant dense<0.000000e+00> : vector<8x128xf32>
    %51 = tpu.matmul %49, %50, %cst_25 {dimension_numbers = #tpu.dot_dimension_numbers<[1], [0], [0], [1], [0, 0, 1, 1], [], []>} : vector<8x128xbf16>, vector<128x128xbf16>, vector<8x128xf32> -> vector<8x128xf32>
    %c0_26 = arith.constant 0 : index
    %c128 = arith.constant 128 : index
    %52 = vector.load %arg6[%c0_26, %c128] : memref<8x256xf32, #tpu.memory_space<vmem>>, vector<8x128xf32>
    tpu.vector_store %arg6[%c0_26, %c128], %51 {strides = array<i32>} : memref<8x256xf32, #tpu.memory_space<vmem>>, vector<8x128xf32>,
    return
  }
  func.func @transform_0(%arg0: i32) -> (i32, i32) {
    %c0_i32 = arith.constant 0 : i32
    %c0_i32_0 = arith.constant 0 : i32
    return %arg0, %c0_i32 : i32, i32
  }
  func.func @transform_1(%arg0: i32) -> (i32, i32) {
    %c0_i32 = arith.constant 0 : i32
    %c0_i32_0 = arith.constant 0 : i32
    %c0_i32_1 = arith.constant 0 : i32
    return %c0_i32, %c0_i32_0 : i32, i32
  }
  func.func @transform_2(%arg0: i32) -> (i32, i32) {
    %c0_i32 = arith.constant 0 : i32
    %c0_i32_0 = arith.constant 0 : i32
    %c0_i32_1 = arith.constant 0 : i32
    return %c0_i32, %c0_i32_0 : i32, i32
  }
  func.func @transform_3(%arg0: i32) -> (i32, i32, i32) {
    %c0_i32 = arith.constant 0 : i32
    %c0_i32_0 = arith.constant 0 : i32
    %c0_i32_1 = arith.constant 0 : i32
    %c0_i32_2 = arith.constant 0 : i32
    return %c0_i32, %c0_i32_0, %c0_i32_1 : i32, i32, i32
  }
  func.func @transform_4(%arg0: i32) -> (i32, i32) {
    %c0_i32 = arith.constant 0 : i32
    %c0_i32_0 = arith.constant 0 : i32
    %c0_i32_1 = arith.constant 0 : i32
    return %c0_i32, %c0_i32_0 : i32, i32
  }
  func.func @transform_5(%arg0: i32) -> (i32, i32) {
    %c0_i32 = arith.constant 0 : i32
    %c0_i32_0 = arith.constant 0 : i32
    return %arg0, %c0_i32 : i32, i32
  }
}

</mosaic_0001>

<bundles_post_ra>
// kernel: cgc_forward.1
= control target key start
LH: loop header
LB: loop body
LE: loop exit
PB: predicated region body
PF: predicated region fallthrough
CT: control target
= control target key end

     0   :  { %10 = vsyncpa [#allocation3], 0  ;;  %s1150_s0 = inlined_call_operand.hbm [shape: f32[8,32], index: 0, kind: input, shape index: {}]   ;;  %s1151_s1 = inlined_call_operand.hbm [shape: bf16[32,384], index: 1, kind: input, shape index: {}]   ;;  %s1152_s2 = inlined_call_operand.vmem [shape: f32[1,384], index: 2, kind: input, shape index: {}]   ;;  %s1153_s3 = inlined_call_operand.hbm [shape: bf16[2,128,128], index: 3, kind: input, shape index: {}]   ;;  %s1154_s4 = inlined_call_operand.hbm [shape: bf16[128,128], index: 4, kind: input, shape index: {}]   ;;  %s1155_s5 = inlined_call_operand.vmem [shape: f32[8,256], index: 5, kind: output, shape index: {}]  }
   0x1   :  { %11 = vsyncpa [#allocation5], 0 }
   0x2   :  { %12 = vsyncpa [#allocation8], 0  ;;  %s991_s18 = smov [#allocation4]   ;;  %s897_s22 = scalar_lea.hbm %s1151_s1, 768 }
   0x3   :  { %s28_s19 = sshll.u32 %s991_s18, 4  ;;  %p898_p0 = scmp.ne.s32.totalorder %s1151_s1, %s897_s22  ;;  %s29_s19 = int_to_ptr.vmem [resolvable:$true] %s28_s19 }
   0x4   :  { %p901_p1 = scmp.lt.u32.totalorder %s897_s22, %s1151_s1 }
   0x6   :  { %p903_p2 = pnand %p901_p1, %p898_p0 }
   0x8   :  { %906 = shalt.err (!%p903_p2)
}
   0x9   :  { %s907_s27 = scalar_lea.vmem %s29_s19, 768  ;;  %p912_p4 = scmp.lt.s32.totalorder %s29_s19, %s29_s19 }
   0xa   :  { %p908_p3 = scmp.ne.s32.totalorder %s29_s19, %s907_s27  ;;  %p913_p5 = scmp.lt.s32.totalorder %s907_s27, %s907_s27 }
   0xc   :  { %p914_p6 = por %p913_p5, %p912_p4 }
   0xe   :  { %p915_p7 = pnand %p914_p6, %p908_p3 }
  0x10   :  { %918 = shalt.err (!%p915_p7)
}
  0x11   :  { %s992_s28 = smov 192   ;;  %s993_s29 = smov 12  }
  0x12   :  { %34 = dma.hbm_to_vmem [thread:$0]  %s1151_s1, 768, %s29_s19, [#allocation5], %s992_s28, %s992_s28, %s993_s29  }
  0x13   :  { %s994_s7 = smov [#allocation2]   ;;  %s995_s9 = smov [#allocation6]  }
  0x14   :  { %s19_s8 = sshll.u32 %s994_s7, 4  ;;  %s42_s10 = sshll.u32 %s995_s9, 4  ;;  %s20_s8 = int_to_ptr.vmem [resolvable:$true] %s19_s8  ;;  %s43_s10 = int_to_ptr.vmem [resolvable:$true] %s42_s10 }
  0x15   :  { %s919_s13 = scalar_lea.hbm %s1150_s0, 128 }
  0x16   :  { %p920_p8 = scmp.ne.s32.totalorder %s1150_s0, %s919_s13  ;;  %p923_p9 = scmp.lt.u32.totalorder %s919_s13, %s1150_s0 }
  0x18   :  { %p925_p10 = pnand %p923_p9, %p920_p8 }
  0x1a   :  { %928 = shalt.err (!%p925_p10)
}
  0x1b   :  { %s929_s1 = scalar_lea.vmem %s20_s8, 128  ;;  %p934_p12 = scmp.lt.s32.totalorder %s20_s8, %s20_s8 }
  0x1c   :  { %p930_p11 = scmp.ne.s32.totalorder %s20_s8, %s929_s1  ;;  %p935_p13 = scmp.lt.s32.totalorder %s929_s1, %s929_s1 }
  0x1e   :  { %p936_p0 = por %p935_p13, %p934_p12 }
  0x20   :  { %p937_p1 = pnand %p936_p0, %p930_p11 }
  0x22   :  { %940 = shalt.err (!%p937_p1)
}
  0x23   :  { %22 = dma.hbm_to_vmem [thread:$0]  %s1150_s0, 128, %s20_s8, [#allocation3]  }
  0x24   :  { %s941_s22 = scalar_lea.hbm %s1153_s3, 2048 }
  0x25   :  { %p942_p2 = scmp.ne.s32.totalorder %s1153_s3, %s941_s22  ;;  %p945_p3 = scmp.lt.u32.totalorder %s941_s22, %s1153_s3 }
  0x27   :  { %p947_p4 = pnand %p945_p3, %p942_p2 }
  0x29   :  { %950 = shalt.err (!%p947_p4)
}
  0x2a   :  { %s951_s27 = scalar_lea.vmem %s43_s10, 2048  ;;  %p956_p6 = scmp.lt.s32.totalorder %s43_s10, %s43_s10 }
  0x2b   :  { %p952_p5 = scmp.ne.s32.totalorder %s43_s10, %s951_s27  ;;  %p957_p7 = scmp.lt.s32.totalorder %s951_s27, %s951_s27 }
  0x2d   :  { %p958_p8 = por %p957_p7, %p956_p6 }
  0x2f   :  { %p959_p9 = pnand %p958_p8, %p952_p5 }
  0x31   :  { %962 = shalt.err (!%p959_p9)
}
  0x32   :  { %s996_s0 = smov 64   ;;  %s997_s28 = smov 4  }
  0x33   :  { %48 = dma.hbm_to_vmem [thread:$0]  %s1153_s3, 2048, %s43_s10, [#allocation5], %s996_s0, %s996_s0, %s997_s28  }
  0x34   :  { %s998_s6 = smov [#allocation7]   ;;  %s963_s11 = scalar_lea.hbm %s1154_s4, 1024 }
  0x35   :  { %s54_s7 = sshll.u32 %s998_s6, 4  ;;  %p964_p10 = scmp.ne.s32.totalorder %s1154_s4, %s963_s11  ;;  %s55_s7 = int_to_ptr.vmem [resolvable:$true] %s54_s7 }
  0x36   :  { %p967_p11 = scmp.lt.u32.totalorder %s963_s11, %s1154_s4 }
  0x38   :  { %p969_p12 = pnand %p967_p11, %p964_p10 }
  0x3a   :  { %972 = shalt.err (!%p969_p12)
}
  0x3b   :  { %s973_s16 = scalar_lea.vmem %s55_s7, 1024  ;;  %p978_p0 = scmp.lt.s32.totalorder %s55_s7, %s55_s7 }
  0x3c   :  { %p974_p13 = scmp.ne.s32.totalorder %s55_s7, %s973_s16  ;;  %p979_p1 = scmp.lt.s32.totalorder %s973_s16, %s973_s16 }
  0x3e   :  { %p980_p2 = por %p979_p1, %p978_p0 }
  0x40   :  { %p981_p3 = pnand %p980_p2, %p974_p13 }
  0x42   :  { %984 = shalt.err (!%p981_p3)
}
  0x43   :  { %60 = dma.hbm_to_vmem [thread:$0]  %s1154_s4, 1024, %s55_s7, [#allocation8], %s996_s0, %s996_s0, %s997_s28  }
  0x44   :  { %985 = dma.done.wait [#allocation3], 128  }
  0x45   :  { %986 = vsyncadd [#allocation3], 4294967168 }
  0x46   :  { %987 = dma.done.wait [#allocation5], 2816  }
  0x47   :  { %988 = vsyncadd [#allocation5], 4294964480 }
  0x48   :  { %989 = dma.done.wait [#allocation8], 1024  }
  0x49   :  { %990 = vsyncadd [#allocation8], 4294966272  ;;  %v999_v0 = vmov 0.0   ;;  %v1000_v1 = vmov 0   ;;  %vm1001_vm0 = vmmov 0   ;;  %v74_v7 = vld [vmem:[#allocation2] sm:$0xff]  ;;  %v86_v10 = vlaneseq }
  0x4a   :  { %750 = vmatprep.subr.bf16.mxu1 %v999_v0  ;;  %169 = vmatprep.mubr.bf16.mxu0 %v1000_v1  ;;  %v849_v2 = vld [vmem:[#allocation4 + $0x4] ss:$12 sps:$4 sm:$0xff]   ;;  %v851_v3 = vld [vmem:[#allocation4] ss:$12 sps:$4 sm:$0xff]   ;;  %v852_v4 = vld [vmem:[#allocation4 + $0x1c] ss:$12 sps:$4 sm:$0xff]   ;;  %v75_v9 = vpack.c.bf16 %v74_v7, %v74_v7 }
  0x4b   :  { %754 = vmatprep.mubr.msk.bf16.mxu1 %vm1001_vm0, %v999_v0  ;;  %137 = vmatprep.subr.bf16.mxu0 %v849_v2  ;;  %v854_v5 = vld [vmem:[#allocation4 + $0x18] ss:$12 sps:$4 sm:$0xff]   ;;  %v855_v6 = vld [vmem:[#allocation4 + $0x8] ss:$12 sps:$4 sm:$0xff]   ;;  %vm133_vm1 = vcmask 261120   ;;  %v1090_v11 = vshrl.u32 %v86_v10, 7 }
  0x4c   :  { %138 = vmatpush1.bf16.msra.mxu0 %v851_v3  ;;  %751 = vmatpush3.bf16.msra.mxu1 %v855_v6  ;;  %v856_v8 = vld [vmem:[#allocation4 + $0x20] ss:$12 sps:$4 sm:$0xff]   ;;  %v1096_v13 = vld [vmem:[%s1152_s2] sm:$0x7]  ;;  %v857_v27 = vld [vmem:[#allocation6] sm:$0xff]  }
  0x4d   :  { %139 = vmatprep.subr.bf16.mxu0 %v852_v4  ;;  %752 = vmatprep.subr.bf16.mxu1 %v999_v0  ;;  %v92_v12 = vsub.s32 1, %v1090_v11  ;;  %v96_v14 = vsub.s32 2, %v1090_v11  ;;  %v858_v28 = vld [vmem:[#allocation6 + $0x8] sm:$0xff]   ;;  %v859_v29 = vld [vmem:[#allocation6 + $0x10] sm:$0xff]   ;;  %v860_v30 = vld [vmem:[#allocation6 + $0x18] sm:$0xff]   ;;  %v88_v4 = vsub.s32 0, %v1090_v11 }
  0x4e   :  { %v861_v31 = vld [vmem:[#allocation6 + $0x20] sm:$0xff]   ;;  %v862_v40 = vld [vmem:[#allocation6 + $0x28] sm:$0xff]   ;;  %v863_v41 = vld [vmem:[#allocation6 + $0x30] sm:$0xff]  }
  0x4f   :  { %v93_v15 = vrot.slane %v1096_v13, %v92_v12  ;;  %v97_v17 = vrot.slane %v1096_v13, %v96_v14  ;;  %v864_v42 = vld [vmem:[#allocation6 + $0x38] sm:$0xff]   ;;  %v873_v43 = vld [vmem:[#allocation7] sm:$0xff]   ;;  %v874_v44 = vld [vmem:[#allocation7 + $0x8] sm:$0xff]  }
  0x50   :  { %140 = vmatpush1.bf16.msra.mxu0 %v854_v5  ;;  %753 = vmatpush3.bf16.msra.mxu1 %v856_v8  ;;  %v875_v45 = vld [vmem:[#allocation7 + $0x10] sm:$0xff]   ;;  %v876_v46 = vld [vmem:[#allocation7 + $0x18] sm:$0xff]   ;;  %v877_v47 = vld [vmem:[#allocation7 + $0x20] sm:$0xff]   ;;  %v89_v5 = vrot.slane %v1096_v13, %v88_v4 }
  0x51   :  { %758 = vmatprep.subr.bf16.mxu0 %v999_v0  ;;  %778 = vmatprep.subr.bf16.mxu1 %v999_v0  ;;  %v878_v48 = vld [vmem:[#allocation7 + $0x28] sm:$0xff]   ;;  %v879_v49 = vld [vmem:[#allocation7 + $0x30] sm:$0xff]   ;;  %v865_v53 = vld [vmem:[#allocation6 + $0x40] sm:$0xff]  }
  0x52   :  { %v866_v55 = vld [vmem:[#allocation6 + $0x48] sm:$0xff]   ;;  %v867_v56 = vld [vmem:[#allocation6 + $0x50] sm:$0xff]   ;;  %v868_v57 = vld [vmem:[#allocation6 + $0x58] sm:$0xff]  }
  0x53   :  { %677 = vmatmul.mubr.msk.bf16.vlgmr.msra.gmra.mrb[0].mxu0 %vm133_vm1, %v75_v9  ;;  %755 = vmatmul.mubr.msk.bf16.vlgmr.msra.gmra.mrb[0].mxu1 %vm133_vm1, %v75_v9  ;;  %v869_v59 = vld [vmem:[#allocation6 + $0x60] sm:$0xff]   ;;  %v870_v60 = vld [vmem:[#allocation6 + $0x68] sm:$0xff]   ;;  %v871_v61 = vld [vmem:[#allocation6 + $0x70] sm:$0xff]  }
  0x54   :  { %774 = vmatprep.mubr.msk.bf16.mxu0 %vm1001_vm0, %v999_v0  ;;  %794 = vmatprep.mubr.msk.bf16.mxu1 %vm1001_vm0, %v999_v0  ;;  %v872_v63 = vld [vmem:[#allocation6 + $0x78] sm:$0xff]   ;;  %v883_v11 = vld [vmem:[#allocation7 + $0x10] sm:$0xff]  }
  0x55   :  { %759 = vmatpush3.bf16.msra.mxu0 %v857_v27  ;;  %779 = vmatpush3.bf16.msra.mxu1 %v873_v43  ;;  %v880_v3 = vld [vmem:[#allocation7 + $0x38] sm:$0xff]  }
  0x56   :  { %760 = vmatprep.subr.bf16.mxu0 %v999_v0  ;;  %780 = vmatprep.subr.bf16.mxu1 %v999_v0  ;;  %v884_v13 = vld [vmem:[#allocation7 + $0x18] sm:$0xff]  }
  0x59   :  { %761 = vmatpush3.bf16.msra.mxu0 %v858_v28  ;;  %781 = vmatpush3.bf16.msra.mxu1 %v874_v44 }
  0x5a   :  { %762 = vmatprep.subr.bf16.mxu0 %v999_v0  ;;  %782 = vmatprep.subr.bf16.mxu1 %v999_v0 }
  0x5d   :  { %763 = vmatpush3.bf16.msra.mxu0 %v859_v29  ;;  %783 = vmatpush3.bf16.msra.mxu1 %v875_v45 }
  0x5e   :  { %764 = vmatprep.subr.bf16.mxu0 %v999_v0  ;;  %784 = vmatprep.subr.bf16.mxu1 %v999_v0 }
  0x61   :  { %765 = vmatpush3.bf16.msra.mxu0 %v860_v30  ;;  %785 = vmatpush3.bf16.msra.mxu1 %v876_v46 }
  0x62   :  { %766 = vmatprep.subr.bf16.mxu0 %v999_v0  ;;  %786 = vmatprep.subr.bf16.mxu1 %v999_v0 }
  0x65   :  { %767 = vmatpush3.bf16.msra.mxu0 %v861_v31  ;;  %787 = vmatpush3.bf16.msra.mxu1 %v877_v47 }
  0x66   :  { %768 = vmatprep.subr.bf16.mxu0 %v999_v0  ;;  %788 = vmatprep.subr.bf16.mxu1 %v999_v0 }
  0x69   :  { %769 = vmatpush3.bf16.msra.mxu0 %v862_v40  ;;  %789 = vmatpush3.bf16.msra.mxu1 %v878_v48 }
  0x6a   :  { %770 = vmatprep.subr.bf16.mxu0 %v999_v0  ;;  %790 = vmatprep.subr.bf16.mxu1 %v999_v0 }
  0x6d   :  { %771 = vmatpush3.bf16.msra.mxu0 %v863_v41  ;;  %791 = vmatpush3.bf16.msra.mxu1 %v879_v49 }
  0x6e   :  { %772 = vmatprep.subr.bf16.mxu0 %v999_v0  ;;  %792 = vmatprep.subr.bf16.mxu1 %v999_v0 }
  0x71   :  { %773 = vmatpush3.bf16.msra.mxu0 %v864_v42  ;;  %793 = vmatpush3.bf16.msra.mxu1 %v880_v3 }
  0x72   :  { %798 = vmatprep.subr.bf16.mxu0 %v999_v0  ;;  %818 = vmatprep.subr.bf16.mxu1 %v999_v0 }
 0x126   :  { %v1100_v16 = vpop.f32.mrb[0].mxu0  ;;  %v212_v21 = vpop.f32.mrb[0].mxu1 }
 0x127   :  { %v173_v18 = vpop.f32.mrb[1].mxu0  ;;  %v756_v23 = vpop.f32.mrb[1].mxu1  ;;  %v213_v24 = vadd.f32 %v212_v21, %v97_v17  ;;  %v172_v6 = vadd.f32 %v1100_v16, %v89_v5  ;;  %v885_v16 = vld [vmem:[#allocation7 + $0x20] sm:$0xff]   ;;  %v887_v21 = vld [vmem:[#allocation7 + $0x30] sm:$0xff]  }
 0x128   :  { %v174_v19 = vadd.f32 %v173_v18, %v93_v15  ;;  %v175_v20 = vpop.f32.mrb[2].mxu0  ;;  %v215_v25 = vpop.f32.mrb[2].mxu1  ;;  %v881_v15 = vld [vmem:[#allocation7] sm:$0xff]  }
 0x129   :  { %v176_v22 = vpop.f32.mrb[3].mxu0  ;;  %v757_v26 = vpop.f32.mrb[3].mxu1  ;;  %v219_v7 = vmul.f32 0.01, %v172_v6  ;;  %vm218_vm2 = vcmp.gt.f32.partialorder %v172_v6, 0.0  ;;  %v886_v20 = vld [vmem:[#allocation7 + $0x28] sm:$0xff]  }
 0x12a   :  { %221 = vmax.xlane.f32.xlu0 %v174_v19  ;;  %v888_v22 = vld [vmem:[#allocation7 + $0x38] sm:$0xff]  }
 0x12b   :  { %v220_v8 = vsel %vm218_vm2, %v172_v6, %v219_v7 }
 0x12e   :  { %442 = vmax.xlane.f32.xlu0 %v213_v24 }
 0x1b7   :  { %v222_v32 = vpop.xlane.xlu0 %221 }
 0x1b8   :  { %v223_v33 = vsub.f32 %v174_v19, %v222_v32  ;;  %v882_v19 = vld [vmem:[#allocation7 + $0x8] sm:$0xff]  }
 0x1ba   :  { %v224_v34 = vmul.f32 1.442695, %v223_v33 }
 0x1bb   :  { %v443_v35 = vpop.xlane.xlu0 %442 }
 0x1bc   :  { %889 = vpow2.f32 %v224_v34  ;;  %v444_v36 = vsub.f32 %v213_v24, %v443_v35 }
 0x1be   :  { %v445_v37 = vmul.f32 1.442695, %v444_v36 }
 0x1c0   :  { %891 = vpow2.f32 %v445_v37 }
 0x1c6   :  { %v890_v38 = vpop.eup %889 }
 0x1c7   :  { %226 = vadd.xlane.f32.xlu1 %v890_v38 }
 0x1ca   :  { %v1108_v39 = vpop.eup %891 }
 0x1cb   :  { %447 = vadd.xlane.f32.xlu1 %v1108_v39 }
 0x254   :  { %v227_v50 = vpop.xlane.xlu1 %226 }
 0x255   :  { %893 = vrcp.f32 %v227_v50 }
 0x258   :  { %v448_v58 = vpop.xlane.xlu1 %447 }
 0x259   :  { %895 = vrcp.f32 %v448_v58 }
 0x25f   :  { %v894_v51 = vpop.eup %893 }
 0x260   :  { %v229_v52 = vmul.f32 %v894_v51, %v890_v38 }
 0x262   :  { %v230_v54 = vpack.c.bf16 %v229_v52, %v229_v52 }
 0x263   :  { %v896_v62 = vpop.eup %895 }
 0x264   :  { %775 = vmatmul.mubr.bf16.vlgmr.msra.gmra.mrb[4].mxu0 %v230_v54  ;;  %v450_v1 = vmul.f32 %v896_v62, %v1108_v39 }
 0x265   :  { %799 = vmatpush3.bf16.msra.mxu0 %v865_v53  ;;  %814 = vmatprep.mubr.msk.bf16.mxu0 %vm1001_vm0, %v999_v0 }
 0x266   :  { %800 = vmatprep.subr.bf16.mxu0 %v999_v0  ;;  %v451_v2 = vpack.c.bf16 %v450_v1, %v450_v1 }
 0x269   :  { %801 = vmatpush3.bf16.msra.mxu0 %v866_v55 }
 0x26a   :  { %802 = vmatprep.subr.bf16.mxu0 %v999_v0 }
 0x26d   :  { %803 = vmatpush3.bf16.msra.mxu0 %v867_v56 }
 0x26e   :  { %804 = vmatprep.subr.bf16.mxu0 %v999_v0 }
 0x271   :  { %805 = vmatpush3.bf16.msra.mxu0 %v868_v57 }
 0x272   :  { %806 = vmatprep.subr.bf16.mxu0 %v999_v0 }
 0x275   :  { %807 = vmatpush3.bf16.msra.mxu0 %v869_v59 }
 0x276   :  { %808 = vmatprep.subr.bf16.mxu0 %v999_v0 }
 0x279   :  { %809 = vmatpush3.bf16.msra.mxu0 %v870_v60 }
 0x27a   :  { %810 = vmatprep.subr.bf16.mxu0 %v999_v0 }
 0x27d   :  { %811 = vmatpush3.bf16.msra.mxu0 %v871_v61 }
 0x27e   :  { %812 = vmatprep.subr.bf16.mxu0 %v999_v0 }
 0x281   :  { %813 = vmatpush3.bf16.msra.mxu0 %v872_v63 }
 0x284   :  { %815 = vmatmul.mubr.bf16.vlgmr.msra.gmra.mrb[8].mxu0 %v451_v2 }
 0x337   :  { %v329_v9 = vpop.f32.mrb[4].mxu0 }
 0x338   :  { %v335_v10 = vmul.f32 %v329_v9, %v220_v8  ;;  %v776_v12 = vpop.f32.mrb[5].mxu0 }
 0x339   :  { %v332_v14 = vpop.f32.mrb[6].mxu0 }
 0x33a   :  { %v336_v17 = vpack.c.bf16 %v335_v10, %v335_v10  ;;  %v777_v18 = vpop.f32.mrb[7].mxu0 }
 0x33c   :  { %795 = vmatmul.mubr.bf16.vlgmr.msra.gmra.mrb[4].mxu1 %v336_v17 }
 0x33d   :  { %819 = vmatpush3.bf16.msra.mxu1 %v881_v15  ;;  %834 = vmatprep.mubr.msk.bf16.mxu1 %vm1001_vm0, %v999_v0 }
 0x33e   :  { %820 = vmatprep.subr.bf16.mxu1 %v999_v0 }
 0x341   :  { %821 = vmatpush3.bf16.msra.mxu1 %v882_v19 }
 0x342   :  { %822 = vmatprep.subr.bf16.mxu1 %v999_v0 }
 0x345   :  { %823 = vmatpush3.bf16.msra.mxu1 %v883_v11 }
 0x346   :  { %824 = vmatprep.subr.bf16.mxu1 %v999_v0 }
 0x349   :  { %825 = vmatpush3.bf16.msra.mxu1 %v884_v13 }
 0x34a   :  { %826 = vmatprep.subr.bf16.mxu1 %v999_v0 }
 0x34d   :  { %827 = vmatpush3.bf16.msra.mxu1 %v885_v16 }
 0x34e   :  { %828 = vmatprep.subr.bf16.mxu1 %v999_v0 }
 0x351   :  { %829 = vmatpush3.bf16.msra.mxu1 %v886_v20 }
 0x352   :  { %830 = vmatprep.subr.bf16.mxu1 %v999_v0 }
 0x355   :  { %831 = vmatpush3.bf16.msra.mxu1 %v887_v21 }
 0x356   :  { %832 = vmatprep.subr.bf16.mxu1 %v999_v0 }
 0x357   :  { %v551_v23 = vpop.f32.mrb[8].mxu0 }
 0x358   :  { %v557_v24 = vmul.f32 %v551_v23, %v220_v8  ;;  %v816_v25 = vpop.f32.mrb[9].mxu0 }
 0x359   :  { %v554_v26 = vpop.f32.mrb[10].mxu0  ;;  %833 = vmatpush3.bf16.msra.mxu1 %v888_v22 }
 0x35a   :  { %v558_v27 = vpack.c.bf16 %v557_v24, %v557_v24  ;;  %v817_v28 = vpop.f32.mrb[11].mxu0 }
 0x35c   :  { %835 = vmatmul.mubr.bf16.vlgmr.msra.gmra.mrb[8].mxu1 %v558_v27 }
 0x40f   :  { %v435_v29 = vpop.f32.mrb[4].mxu1 }
 0x410   :  { %441 = vst [vmem:[%s1155_s5] sm:$0xff] %v435_v29  ;;  %v796_v30 = vpop.f32.mrb[5].mxu1 }
 0x411   :  { %v438_v31 = vpop.f32.mrb[6].mxu1 }
 0x412   :  { %v797_v32 = vpop.f32.mrb[7].mxu1 }
 0x42f   :  { %v657_v33 = vpop.f32.mrb[8].mxu1 }
 0x430   :  { %663 = vst [vmem:[%s1155_s5 + $0x8] sm:$0xff] %v657_v33  ;;  %v836_v0 = vpop.f32.mrb[9].mxu1 }
 0x431   :  { %v660_v34 = vpop.f32.mrb[10].mxu1 }
 0x432   :  { %v837_v35 = vpop.f32.mrb[11].mxu1 }
 0x433   :  { %668 = vsyncpa [#allocation3], 1 }
 0x434   :  { %669 = vsyncpa [#allocation5], 1 }
 0x435   :  { %670 = vsyncpa [#allocation8], 1 }

// kernel: cgc_forward.1
= control target key start
LH: loop header
LB: loop body
LE: loop exit
PB: predicated region body
PF: predicated region fallthrough
CT: control target
= control target key end

     0   :  { %10 = vsyncpa [#allocation3], 0  ;;  %s1150_s0 = inlined_call_operand.hbm [shape: f32[8,32], index: 0, kind: input, shape index: {}]   ;;  %s1151_s1 = inlined_call_operand.hbm [shape: bf16[32,384], index: 1, kind: input, shape index: {}]   ;;  %s1152_s2 = inlined_call_operand.vmem [shape: f32[1,384], index: 2, kind: input, shape index: {}]   ;;  %s1153_s3 = inlined_call_operand.hbm [shape: bf16[2,128,128], index: 3, kind: input, shape index: {}]   ;;  %s1154_s4 = inlined_call_operand.hbm [shape: bf16[128,128], index: 4, kind: input, shape index: {}]   ;;  %s1155_s5 = inlined_call_operand.vmem [shape: f32[8,256], index: 5, kind: output, shape index: {}]  }
   0x1   :  { %11 = vsyncpa [#allocation5], 0 }
   0x2   :  { %12 = vsyncpa [#allocation8], 0  ;;  %s991_s18 = smov [#allocation4]   ;;  %s897_s22 = scalar_lea.hbm %s1151_s1, 768 }
   0x3   :  { %s28_s19 = sshll.u32 %s991_s18, 4  ;;  %p898_p0 = scmp.ne.s32.totalorder %s1151_s1, %s897_s22  ;;  %s29_s19 = int_to_ptr.vmem [resolvable:$true] %s28_s19 }
   0x4   :  { %p901_p1 = scmp.lt.u32.totalorder %s897_s22, %s1151_s1 }
   0x6   :  { %p903_p2 = pnand %p901_p1, %p898_p0 }
   0x8   :  { %906 = shalt.err (!%p903_p2)
}
   0x9   :  { %s907_s27 = scalar_lea.vmem %s29_s19, 768  ;;  %p912_p4 = scmp.lt.s32.totalorder %s29_s19, %s29_s19 }
   0xa   :  { %p908_p3 = scmp.ne.s32.totalorder %s29_s19, %s907_s27  ;;  %p913_p5 = scmp.lt.s32.totalorder %s907_s27, %s907_s27 }
   0xc   :  { %p914_p6 = por %p913_p5, %p912_p4 }
   0xe   :  { %p915_p7 = pnand %p914_p6, %p908_p3 }
  0x10   :  { %918 = shalt.err (!%p915_p7)
}
  0x11   :  { %s992_s28 = smov 192   ;;  %s993_s29 = smov 12  }
  0x12   :  { %34 = dma.hbm_to_vmem [thread:$0]  %s1151_s1, 768, %s29_s19, [#allocation5], %s992_s28, %s992_s28, %s993_s29  }
  0x13   :  { %s994_s7 = smov [#allocation2]   ;;  %s995_s9 = smov [#allocation6]  }
  0x14   :  { %s19_s8 = sshll.u32 %s994_s7, 4  ;;  %s42_s10 = sshll.u32 %s995_s9, 4  ;;  %s20_s8 = int_to_ptr.vmem [resolvable:$true] %s19_s8  ;;  %s43_s10 = int_to_ptr.vmem [resolvable:$true] %s42_s10 }
  0x15   :  { %s919_s13 = scalar_lea.hbm %s1150_s0, 128 }
  0x16   :  { %p920_p8 = scmp.ne.s32.totalorder %s1150_s0, %s919_s13  ;;  %p923_p9 = scmp.lt.u32.totalorder %s919_s13, %s1150_s0 }
  0x18   :  { %p925_p10 = pnand %p923_p9, %p920_p8 }
  0x1a   :  { %928 = shalt.err (!%p925_p10)
}
  0x1b   :  { %s929_s1 = scalar_lea.vmem %s20_s8, 128  ;;  %p934_p12 = scmp.lt.s32.totalorder %s20_s8, %s20_s8 }
  0x1c   :  { %p930_p11 = scmp.ne.s32.totalorder %s20_s8, %s929_s1  ;;  %p935_p13 = scmp.lt.s32.totalorder %s929_s1, %s929_s1 }
  0x1e   :  { %p936_p0 = por %p935_p13, %p934_p12 }
  0x20   :  { %p937_p1 = pnand %p936_p0, %p930_p11 }
  0x22   :  { %940 = shalt.err (!%p937_p1)
}
  0x23   :  { %22 = dma.hbm_to_vmem [thread:$0]  %s1150_s0, 128, %s20_s8, [#allocation3]  }
  0x24   :  { %s941_s22 = scalar_lea.hbm %s1153_s3, 2048 }
  0x25   :  { %p942_p2 = scmp.ne.s32.totalorder %s1153_s3, %s941_s22  ;;  %p945_p3 = scmp.lt.u32.totalorder %s941_s22, %s1153_s3 }
  0x27   :  { %p947_p4 = pnand %p945_p3, %p942_p2 }
  0x29   :  { %950 = shalt.err (!%p947_p4)
}
  0x2a   :  { %s951_s27 = scalar_lea.vmem %s43_s10, 2048  ;;  %p956_p6 = scmp.lt.s32.totalorder %s43_s10, %s43_s10 }
  0x2b   :  { %p952_p5 = scmp.ne.s32.totalorder %s43_s10, %s951_s27  ;;  %p957_p7 = scmp.lt.s32.totalorder %s951_s27, %s951_s27 }
  0x2d   :  { %p958_p8 = por %p957_p7, %p956_p6 }
  0x2f   :  { %p959_p9 = pnand %p958_p8, %p952_p5 }
  0x31   :  { %962 = shalt.err (!%p959_p9)
}
  0x32   :  { %s996_s0 = smov 64   ;;  %s997_s28 = smov 4  }
  0x33   :  { %48 = dma.hbm_to_vmem [thread:$0]  %s1153_s3, 2048, %s43_s10, [#allocation5], %s996_s0, %s996_s0, %s997_s28  }
  0x34   :  { %s998_s6 = smov [#allocation7]   ;;  %s963_s11 = scalar_lea.hbm %s1154_s4, 1024 }
  0x35   :  { %s54_s7 = sshll.u32 %s998_s6, 4  ;;  %p964_p10 = scmp.ne.s32.totalorder %s1154_s4, %s963_s11  ;;  %s55_s7 = int_to_ptr.vmem [resolvable:$true] %s54_s7 }
  0x36   :  { %p967_p11 = scmp.lt.u32.totalorder %s963_s11, %s1154_s4 }
  0x38   :  { %p969_p12 = pnand %p967_p11, %p964_p10 }
  0x3a   :  { %972 = shalt.err (!%p969_p12)
}
  0x3b   :  { %s973_s16 = scalar_lea.vmem %s55_s7, 1024  ;;  %p978_p0 = scmp.lt.s32.totalorder %s55_s7, %s55_s7 }
  0x3c   :  { %p974_p13 = scmp.ne.s32.totalorder %s55_s7, %s973_s16  ;;  %p979_p1 = scmp.lt.s32.totalorder %s973_s16, %s973_s16 }
  0x3e   :  { %p980_p2 = por %p979_p1, %p978_p0 }
  0x40   :  { %p981_p3 = pnand %p980_p2, %p974_p13 }
  0x42   :  { %984 = shalt.err (!%p981_p3)
}
  0x43   :  { %60 = dma.hbm_to_vmem [thread:$0]  %s1154_s4, 1024, %s55_s7, [#allocation8], %s996_s0, %s996_s0, %s997_s28  }
  0x44   :  { %985 = dma.done.wait [#allocation3], 128  }
  0x45   :  { %986 = vsyncadd [#allocation3], 4294967168 }
  0x46   :  { %987 = dma.done.wait [#allocation5], 2816  }
  0x47   :  { %988 = vsyncadd [#allocation5], 4294964480 }
  0x48   :  { %989 = dma.done.wait [#allocation8], 1024  }
  0x49   :  { %990 = vsyncadd [#allocation8], 4294966272  ;;  %v999_v0 = vmov 0.0   ;;  %v1000_v1 = vmov 0   ;;  %vm1001_vm0 = vmmov 0   ;;  %v74_v7 = vld [vmem:[#allocation2] sm:$0xff]  ;;  %v86_v10 = vlaneseq }
  0x4a   :  { %750 = vmatprep.subr.bf16.mxu1 %v999_v0  ;;  %169 = vmatprep.mubr.bf16.mxu0 %v1000_v1  ;;  %v849_v2 = vld [vmem:[#allocation4 + $0x4] ss:$12 sps:$4 sm:$0xff]   ;;  %v851_v3 = vld [vmem:[#allocation4] ss:$12 sps:$4 sm:$0xff]   ;;  %v852_v4 = vld [vmem:[#allocation4 + $0x1c] ss:$12 sps:$4 sm:$0xff]   ;;  %v75_v9 = vpack.c.bf16 %v74_v7, %v74_v7 }
  0x4b   :  { %754 = vmatprep.mubr.msk.bf16.mxu1 %vm1001_vm0, %v999_v0  ;;  %137 = vmatprep.subr.bf16.mxu0 %v849_v2  ;;  %v854_v5 = vld [vmem:[#allocation4 + $0x18] ss:$12 sps:$4 sm:$0xff]   ;;  %v855_v6 = vld [vmem:[#allocation4 + $0x8] ss:$12 sps:$4 sm:$0xff]   ;;  %vm133_vm1 = vcmask 261120   ;;  %v1090_v11 = vshrl.u32 %v86_v10, 7 }
  0x4c   :  { %138 = vmatpush1.bf16.msra.mxu0 %v851_v3  ;;  %751 = vmatpush3.bf16.msra.mxu1 %v855_v6  ;;  %v856_v8 = vld [vmem:[#allocation4 + $0x20] ss:$12 sps:$4 sm:$0xff]   ;;  %v1096_v13 = vld [vmem:[%s1152_s2] sm:$0x7]  ;;  %v857_v27 = vld [vmem:[#allocation6] sm:$0xff]  }
  0x4d   :  { %139 = vmatprep.subr.bf16.mxu0 %v852_v4  ;;  %752 = vmatprep.subr.bf16.mxu1 %v999_v0  ;;  %v92_v12 = vsub.s32 1, %v1090_v11  ;;  %v96_v14 = vsub.s32 2, %v1090_v11  ;;  %v858_v28 = vld [vmem:[#allocation6 + $0x8] sm:$0xff]   ;;  %v859_v29 = vld [vmem:[#allocation6 + $0x10] sm:$0xff]   ;;  %v860_v30 = vld [vmem:[#allocation6 + $0x18] sm:$0xff]   ;;  %v88_v4 = vsub.s32 0, %v1090_v11 }
  0x4e   :  { %v861_v31 = vld [vmem:[#allocation6 + $0x20] sm:$0xff]   ;;  %v862_v40 = vld [vmem:[#allocation6 + $0x28] sm:$0xff]   ;;  %v863_v41 = vld [vmem:[#allocation6 + $0x30] sm:$0xff]  }
  0x4f   :  { %v93_v15 = vrot.slane %v1096_v13, %v92_v12  ;;  %v97_v17 = vrot.slane %v1096_v13, %v96_v14  ;;  %v864_v42 = vld [vmem:[#allocation6 + $0x38] sm:$0xff]   ;;  %v873_v43 = vld [vmem:[#allocation7] sm:$0xff]   ;;  %v874_v44 = vld [vmem:[#allocation7 + $0x8] sm:$0xff]  }
  0x50   :  { %140 = vmatpush1.bf16.msra.mxu0 %v854_v5  ;;  %753 = vmatpush3.bf16.msra.mxu1 %v856_v8  ;;  %v875_v45 = vld [vmem:[#allocation7 + $0x10] sm:$0xff]   ;;  %v876_v46 = vld [vmem:[#allocation7 + $0x18] sm:$0xff]   ;;  %v877_v47 = vld [vmem:[#allocation7 + $0x20] sm:$0xff]   ;;  %v89_v5 = vrot.slane %v1096_v13, %v88_v4 }
  0x51   :  { %758 = vmatprep.subr.bf16.mxu0 %v999_v0  ;;  %778 = vmatprep.subr.bf16.mxu1 %v999_v0  ;;  %v878_v48 = vld [vmem:[#allocation7 + $0x28] sm:$0xff]   ;;  %v879_v49 = vld [vmem:[#allocation7 + $0x30] sm:$0xff]   ;;  %v865_v53 = vld [vmem:[#allocation6 + $0x40] sm:$0xff]  }
  0x52   :  { %v866_v55 = vld [vmem:[#allocation6 + $0x48] sm:$0xff]   ;;  %v867_v56 = vld [vmem:[#allocation6 + $0x50] sm:$0xff]   ;;  %v868_v57 = vld [vmem:[#allocation6 + $0x58] sm:$0xff]  }
  0x53   :  { %677 = vmatmul.mubr.msk.bf16.vlgmr.msra.gmra.mrb[0].mxu0 %vm133_vm1, %v75_v9  ;;  %755 = vmatmul.mubr.msk.bf16.vlgmr.msra.gmra.mrb[0].mxu1 %vm133_vm1, %v75_v9  ;;  %v869_v59 = vld [vmem:[#allocation6 + $0x60] sm:$0xff]   ;;  %v870_v60 = vld [vmem:[#allocation6 + $0x68] sm:$0xff]   ;;  %v871_v61 = vld [vmem:[#allocation6 + $0x70] sm:$0xff]  }
  0x54   :  { %774 = vmatprep.mubr.msk.bf16.mxu0 %vm1001_vm0, %v999_v0  ;;  %794 = vmatprep.mubr.msk.bf16.mxu1 %vm1001_vm0, %v999_v0  ;;  %v872_v63 = vld [vmem:[#allocation6 + $0x78] sm:$0xff]   ;;  %v883_v11 = vld [vmem:[#allocation7 + $0x10] sm:$0xff]  }
  0x55   :  { %759 = vmatpush3.bf16.msra.mxu0 %v857_v27  ;;  %779 = vmatpush3.bf16.msra.mxu1 %v873_v43  ;;  %v880_v3 = vld [vmem:[#allocation7 + $0x38] sm:$0xff]  }
  0x56   :  { %760 = vmatprep.subr.bf16.mxu0 %v999_v0  ;;  %780 = vmatprep.subr.bf16.mxu1 %v999_v0  ;;  %v884_v13 = vld [vmem:[#allocation7 + $0x18] sm:$0xff]  }
  0x59   :  { %761 = vmatpush3.bf16.msra.mxu0 %v858_v28  ;;  %781 = vmatpush3.bf16.msra.mxu1 %v874_v44 }
  0x5a   :  { %762 = vmatprep.subr.bf16.mxu0 %v999_v0  ;;  %782 = vmatprep.subr.bf16.mxu1 %v999_v0 }
  0x5d   :  { %763 = vmatpush3.bf16.msra.mxu0 %v859_v29  ;;  %783 = vmatpush3.bf16.msra.mxu1 %v875_v45 }
  0x5e   :  { %764 = vmatprep.subr.bf16.mxu0 %v999_v0  ;;  %784 = vmatprep.subr.bf16.mxu1 %v999_v0 }
  0x61   :  { %765 = vmatpush3.bf16.msra.mxu0 %v860_v30  ;;  %785 = vmatpush3.bf16.msra.mxu1 %v876_v46 }
  0x62   :  { %766 = vmatprep.subr.bf16.mxu0 %v999_v0  ;;  %786 = vmatprep.subr.bf16.mxu1 %v999_v0 }
  0x65   :  { %767 = vmatpush3.bf16.msra.mxu0 %v861_v31  ;;  %787 = vmatpush3.bf16.msra.mxu1 %v877_v47 }
  0x66   :  { %768 = vmatprep.subr.bf16.mxu0 %v999_v0  ;;  %788 = vmatprep.subr.bf16.mxu1 %v999_v0 }
  0x69   :  { %769 = vmatpush3.bf16.msra.mxu0 %v862_v40  ;;  %789 = vmatpush3.bf16.msra.mxu1 %v878_v48 }
  0x6a   :  { %770 = vmatprep.subr.bf16.mxu0 %v999_v0  ;;  %790 = vmatprep.subr.bf16.mxu1 %v999_v0 }
  0x6d   :  { %771 = vmatpush3.bf16.msra.mxu0 %v863_v41  ;;  %791 = vmatpush3.bf16.msra.mxu1 %v879_v49 }
  0x6e   :  { %772 = vmatprep.subr.bf16.mxu0 %v999_v0  ;;  %792 = vmatprep.subr.bf16.mxu1 %v999_v0 }
  0x71   :  { %773 = vmatpush3.bf16.msra.mxu0 %v864_v42  ;;  %793 = vmatpush3.bf16.msra.mxu1 %v880_v3 }
  0x72   :  { %798 = vmatprep.subr.bf16.mxu0 %v999_v0  ;;  %818 = vmatprep.subr.bf16.mxu1 %v999_v0 }
 0x126   :  { %v1100_v16 = vpop.f32.mrb[0].mxu0  ;;  %v212_v21 = vpop.f32.mrb[0].mxu1 }
 0x127   :  { %v173_v18 = vpop.f32.mrb[1].mxu0  ;;  %v756_v23 = vpop.f32.mrb[1].mxu1  ;;  %v213_v24 = vadd.f32 %v212_v21, %v97_v17  ;;  %v172_v6 = vadd.f32 %v1100_v16, %v89_v5  ;;  %v885_v16 = vld [vmem:[#allocation7 + $0x20] sm:$0xff]   ;;  %v887_v21 = vld [vmem:[#allocation7 + $0x30] sm:$0xff]  }
 0x128   :  { %v174_v19 = vadd.f32 %v173_v18, %v93_v15  ;;  %v175_v20 = vpop.f32.mrb[2].mxu0  ;;  %v215_v25 = vpop.f32.mrb[2].mxu1  ;;  %v881_v15 = vld [vmem:[#allocation7] sm:$0xff]  }
 0x129   :  { %v176_v22 = vpop.f32.mrb[3].mxu0  ;;  %v757_v26 = vpop.f32.mrb[3].mxu1  ;;  %v219_v7 = vmul.f32 0.01, %v172_v6  ;;  %vm218_vm2 = vcmp.gt.f32.partialorder %v172_v6, 0.0  ;;  %v886_v20 = vld [vmem:[#allocation7 + $0x28] sm:$0xff]  }
 0x12a   :  { %221 = vmax.xlane.f32.xlu0 %v174_v19  ;;  %v888_v22 = vld [vmem:[#allocation7 + $0x38] sm:$0xff]  }
 0x12b   :  { %v220_v8 = vsel %vm218_vm2, %v172_v6, %v219_v7 }
 0x12e   :  { %442 = vmax.xlane.f32.xlu0 %v213_v24 }
 0x1b7   :  { %v222_v32 = vpop.xlane.xlu0 %221 }
 0x1b8   :  { %v223_v33 = vsub.f32 %v174_v19, %v222_v32  ;;  %v882_v19 = vld [vmem:[#allocation7 + $0x8] sm:$0xff]  }
 0x1ba   :  { %v224_v34 = vmul.f32 1.442695, %v223_v33 }
 0x1bb   :  { %v443_v35 = vpop.xlane.xlu0 %442 }
 0x1bc   :  { %889 = vpow2.f32 %v224_v34  ;;  %v444_v36 = vsub.f32 %v213_v24, %v443_v35 }
 0x1be   :  { %v445_v37 = vmul.f32 1.442695, %v444_v36 }
 0x1c0   :  { %891 = vpow2.f32 %v445_v37 }
 0x1c6   :  { %v890_v38 = vpop.eup %889 }
 0x1c7   :  { %226 = vadd.xlane.f32.xlu1 %v890_v38 }
 0x1ca   :  { %v1108_v39 = vpop.eup %891 }
 0x1cb   :  { %447 = vadd.xlane.f32.xlu1 %v1108_v39 }
 0x254   :  { %v227_v50 = vpop.xlane.xlu1 %226 }
 0x255   :  { %893 = vrcp.f32 %v227_v50 }
 0x258   :  { %v448_v58 = vpop.xlane.xlu1 %447 }
 0x259   :  { %895 = vrcp.f32 %v448_v58 }
 0x25f   :  { %v894_v51 = vpop.eup %893 }
 0x260   :  { %v229_v52 = vmul.f32 %v894_v51, %v890_v38 }
 0x262   :  { %v230_v54 = vpack.c.bf16 %v229_v52, %v229_v52 }
 0x263   :  { %v896_v62 = vpop.eup %895 }
 0x264   :  { %775 = vmatmul.mubr.bf16.vlgmr.msra.gmra.mrb[4].mxu0 %v230_v54  ;;  %v450_v1 = vmul.f32 %v896_v62, %v1108_v39 }
 0x265   :  { %799 = vmatpush3.bf16.msra.mxu0 %v865_v53  ;;  %814 = vmatprep.mubr.msk.bf16.mxu0 %vm1001_vm0, %v999_v0 }
 0x266   :  { %800 = vmatprep.subr.bf16.mxu0 %v999_v0  ;;  %v451_v2 = vpack.c.bf16 %v450_v1, %v450_v1 }
 0x269   :  { %801 = vmatpush3.bf16.msra.mxu0 %v866_v55 }
 0x26a   :  { %802 = vmatprep.subr.bf16.mxu0 %v999_v0 }
 0x26d   :  { %803 = vmatpush3.bf16.msra.mxu0 %v867_v56 }
 0x26e   :  { %804 = vmatprep.subr.bf16.mxu0 %v999_v0 }
 0x271   :  { %805 = vmatpush3.bf16.msra.mxu0 %v868_v57 }
 0x272   :  { %806 = vmatprep.subr.bf16.mxu0 %v999_v0 }
 0x275   :  { %807 = vmatpush3.bf16.msra.mxu0 %v869_v59 }
 0x276   :  { %808 = vmatprep.subr.bf16.mxu0 %v999_v0 }
 0x279   :  { %809 = vmatpush3.bf16.msra.mxu0 %v870_v60 }
 0x27a   :  { %810 = vmatprep.subr.bf16.mxu0 %v999_v0 }
 0x27d   :  { %811 = vmatpush3.bf16.msra.mxu0 %v871_v61 }
 0x27e   :  { %812 = vmatprep.subr.bf16.mxu0 %v999_v0 }
 0x281   :  { %813 = vmatpush3.bf16.msra.mxu0 %v872_v63 }
 0x284   :  { %815 = vmatmul.mubr.bf16.vlgmr.msra.gmra.mrb[8].mxu0 %v451_v2 }
 0x337   :  { %v329_v9 = vpop.f32.mrb[4].mxu0 }
 0x338   :  { %v335_v10 = vmul.f32 %v329_v9, %v220_v8  ;;  %v776_v12 = vpop.f32.mrb[5].mxu0 }
 0x339   :  { %v332_v14 = vpop.f32.mrb[6].mxu0 }
 0x33a   :  { %v336_v17 = vpack.c.bf16 %v335_v10, %v335_v10  ;;  %v777_v18 = vpop.f32.mrb[7].mxu0 }
 0x33c   :  { %795 = vmatmul.mubr.bf16.vlgmr.msra.gmra.mrb[4].mxu1 %v336_v17 }
 0x33d   :  { %819 = vmatpush3.bf16.msra.mxu1 %v881_v15  ;;  %834 = vmatprep.mubr.msk.bf16.mxu1 %vm1001_vm0, %v999_v0 }
 0x33e   :  { %820 = vmatprep.subr.bf16.mxu1 %v999_v0 }
 0x341   :  { %821 = vmatpush3.bf16.msra.mxu1 %v882_v19 }
 0x342   :  { %822 = vmatprep.subr.bf16.mxu1 %v999_v0 }
 0x345   :  { %823 = vmatpush3.bf16.msra.mxu1 %v883_v11 }
 0x346   :  { %824 = vmatprep.subr.bf16.mxu1 %v999_v0 }
 0x349   :  { %825 = vmatpush3.bf16.msra.mxu1 %v884_v13 }
 0x34a   :  { %826 = vmatprep.subr.bf16.mxu1 %v999_v0 }
 0x34d   :  { %827 = vmatpush3.bf16.msra.mxu1 %v885_v16 }
 0x34e   :  { %828 = vmatprep.subr.bf16.mxu1 %v999_v0 }
 0x351   :  { %829 = vmatpush3.bf16.msra.mxu1 %v886_v20 }
 0x352   :  { %830 = vmatprep.subr.bf16.mxu1 %v999_v0 }
 0x355   :  { %831 = vmatpush3.bf16.msra.mxu1 %v887_v21 }
 0x356   :  { %832 = vmatprep.subr.bf16.mxu1 %v999_v0 }
 0x357   :  { %v551_v23 = vpop.f32.mrb[8].mxu0 }
 0x358   :  { %v557_v24 = vmul.f32 %v551_v23, %v220_v8  ;;  %v816_v25 = vpop.f32.mrb[9].mxu0 }
 0x359   :  { %v554_v26 = vpop.f32.mrb[10].mxu0  ;;  %833 = vmatpush3.bf16.msra.mxu1 %v888_v22 }
 0x35a   :  { %v558_v27 = vpack.c.bf16 %v557_v24, %v557_v24  ;;  %v817_v28 = vpop.f32.mrb[11].mxu0 }
 0x35c   :  { %835 = vmatmul.mubr.bf16.vlgmr.msra.gmra.mrb[8].mxu1 %v558_v27 }
 0x40f   :  { %v435_v29 = vpop.f32.mrb[4].mxu1 }
 0x410   :  { %441 = vst [vmem:[%s1155_s5] sm:$0xff] %v435_v29  ;;  %v796_v30 = vpop.f32.mrb[5].mxu1 }
 0x411   :  { %v438_v31 = vpop.f32.mrb[6].mxu1 }
 0x412   :  { %v797_v32 = vpop.f32.mrb[7].mxu1 }
 0x42f   :  { %v657_v33 = vpop.f32.mrb[8].mxu1 }
 0x430   :  { %663 = vst [vmem:[%s1155_s5 + $0x8] sm:$0xff] %v657_v33  ;;  %v836_v0 = vpop.f32.mrb[9].mxu1 }
 0x431   :  { %v660_v34 = vpop.f32.mrb[10].mxu1 }
 0x432   :  { %v837_v35 = vpop.f32.mrb[11].mxu1 }
 0x433   :  { %668 = vsyncpa [#allocation3], 1 }
 0x434   :  { %669 = vsyncpa [#allocation5], 1 }
 0x435   :  { %670 = vsyncpa [#allocation8], 1 }

</bundles_post_ra>
